<compile_context>
chip_gen: v5e
topology: v5e:2x2
jax: 0.10.0
libtpu: 0.0.40
codegen_flags: <defaults>
</compile_context>

<pallas_src>
import jax
import jax.numpy as jnp
from jax.experimental import pallas as pl
from jax.experimental.pallas import tpu as pltpu


_TM_MAX = 4096     # rows per grid step (f32: 4096*32*4 = 512 KiB in + 512 KiB out)
_SUBLANE = 8       # f32 sublane granularity


def _choose_tm(B, tm_max=_TM_MAX, sublane=_SUBLANE):
    """Largest multiple-of-8 batch tile <= tm_max that keeps >= 2 grid steps.

    Big tiles amortize the ~0.35 us per-step overhead; >= 2 steps lets the
    BlockSpec pipeline overlap DMA with compute and lets v7x use both
    TensorCores on the "parallel" batch axis.  Tiny batches use a single
    full-extent block (block dim == full array dim is always legal).
    """
    if B <= 2 * sublane:
        return B
    tm = min(tm_max, (B // 2) // sublane * sublane)
    return max(tm, sublane)


def mlp_ode_kernel(x_ref, w_ref, b_ref, o_ref):
    """out_tile = x_tile @ W_eff + b_eff   (Euler step pre-folded into W/b).

    x_ref : VMEM (tm, D)  state tile (streamed over the batch grid)
    w_ref : VMEM (D, D)   I + T * Wx^T        (constant index_map -> resident)
    b_ref : VMEM (1, D)   T * (t0 * Wt + b)   (constant index_map -> resident)
    o_ref : VMEM (tm, D)  output tile (partial last block masked by Pallas)
    """
    o_ref[...] = (
        jnp.dot(x_ref[...], w_ref[...], preferred_element_type=jnp.float32)
        + b_ref[...]
    ).astype(o_ref.dtype)


def prepare_mlp_ode_params(weight, bias, integration_right_limit, t0=0.0,
                           dtype=jnp.float32):
    """One-time prep: fold the single Euler step into an effective (W, b).

    weight : (D, D+1)  nn.Linear(D+1, D).weight layout (column 0 acts on t)
    bias   : (D,)
    Returns (w_eff (D, D), b_eff (1, D)).  Only valid for odeint(method='euler')
    with the time grid [t0, T] (exactly one explicit Euler step).
    """
    D = weight.shape[0]
    assert weight.shape == (D, D + 1), "expected nn.Linear(D+1, D) weight layout"
    dt = float(integration_right_limit) - float(t0)

    wt = weight[:, 0].astype(jnp.float32)        # (D,)   t-column weights
    wx = weight[:, 1:].astype(jnp.float32)       # (D, D) x weights
    w_eff = jnp.eye(D, dtype=jnp.float32) + dt * wx.T          # (D, D)
    b_eff = dt * (t0 * wt + bias.astype(jnp.float32))          # (D,)
    return w_eff.astype(dtype), b_eff.reshape(1, D).astype(dtype)


def mlp_ode_forward(state, w_eff, b_eff, *, tm=None):
    """state: (B, D);  w_eff: (D, D);  b_eff: (1, D)  ->  (B, D)."""
    B, D = state.shape
    assert w_eff.shape == (D, D) and b_eff.shape == (1, D)

    tm_eff = _choose_tm(B) if tm is None else tm
    grid = (pl.cdiv(B, tm_eff),)                 # partial last block is masked

    return pl.pallas_call(
        mlp_ode_kernel,
        out_shape=jax.ShapeDtypeStruct((B, D), state.dtype),
        grid=grid,
        in_specs=[
            pl.BlockSpec((tm_eff, D), lambda i: (i, 0)),   # state tile (streamed)
            pl.BlockSpec((D, D), lambda i: (0, 0)),        # W_eff (VMEM-resident)
            pl.BlockSpec((1, D), lambda i: (0, 0)),        # b_eff (VMEM-resident)
        ],
        out_specs=pl.BlockSpec((tm_eff, D), lambda i: (i, 0)),
        compiler_params=pltpu.CompilerParams(
            dimension_semantics=("parallel",),             # megacore on v7x
        ),
    )(state, w_eff, b_eff)


def _reference(state, weight, bias, T):
    """Pure-JAX reference: one explicit Euler step of ConcatLinear at t = 0."""
    B = state.shape[0]
    ttx = jnp.concatenate([jnp.zeros((B, 1), state.dtype), state], axis=1)
    f = ttx @ weight.T + bias
    return state + T * f


if __name__ == "__main__":
    key = jax.random.PRNGKey(0)
    D = 32                               # layer_size
    INTEGRATION_RIGHT_LIMIT = 1.0

    k_w, k_b, k1, k2, k3 = jax.random.split(key, 5)

    # Deterministic nn.Linear(D+1, D)-style init: U(-1/sqrt(fan_in), +1/sqrt(fan_in))
    bound = 1.0 / float((D + 1) ** 0.5)
    weight = jax.random.uniform(k_w, (D, D + 1), minval=-bound, maxval=bound,
                                dtype=jnp.float32)
    bias = jax.random.uniform(k_b, (D,), minval=-bound, maxval=bound,
                              dtype=jnp.float32)

    # One-time parameter prep (hoisted out of the per-call path).
    w_eff, b_eff = prepare_mlp_ode_params(weight, bias, INTEGRATION_RIGHT_LIMIT)
    fwd = jax.jit(mlp_ode_forward)

    # B=256: even grid (2 tiles); B=300: partial last block (masked writes);
    # B=13 : tiny ragged batch -> single full-extent block.
    for B, k in ((256, k1), (300, k2), (13, k3)):
        state = jax.random.normal(k, (B, D), dtype=jnp.float32)
        out = jax.block_until_ready(fwd(state, w_eff, b_eff))
        ref = _reference(state, weight, bias, INTEGRATION_RIGHT_LIMIT)
        assert out.shape == (B, D)
        assert jnp.allclose(out, ref, atol=1e-4, rtol=1e-5), f"mismatch (B={B})"

    print("KERNEL_OK")
</pallas_src>

<mosaic_0001>
module attributes {stable_mosaic.version = 11 : i64} {
  func.func @mlp_ode_kernel(%arg0: i32, %arg1: memref<128x32xf32, #tpu.memory_space<vmem>>, %arg2: memref<32x32xf32, #tpu.memory_space<vmem>>, %arg3: memref<1x32xf32, #tpu.memory_space<vmem>>, %arg4: memref<128x32xf32, #tpu.memory_space<vmem>>) attributes {dimension_semantics = [#tpu.dimension_semantics<parallel>], iteration_bounds = array<i64: 2>, scalar_prefetch = 0 : i64, scratch_operands = 0 : i64, tpu.core_type = #tpu.core_type<tc>, window_params = [{transform_indices = @transform_0, window_bounds = array<i64: 128, 32>}, {pipeline_mode = #tpu.pipeline_mode<synchronous>, transform_indices = @transform_1, window_bounds = array<i64: 32, 32>}, {pipeline_mode = #tpu.pipeline_mode<synchronous>, transform_indices = @transform_2, window_bounds = array<i64: 1, 32>}, {transform_indices = @transform_3, window_bounds = array<i64: 128, 32>}]} {
    %c0 = arith.constant 0 : index
    %c0_0 = arith.constant 0 : index
    %0 = vector.load %arg1[%c0, %c0_0] : memref<128x32xf32, #tpu.memory_space<vmem>>, vector<128x32xf32>
    %c0_1 = arith.constant 0 : index
    %c0_2 = arith.constant 0 : index
    %1 = vector.load %arg2[%c0_1, %c0_2] : memref<32x32xf32, #tpu.memory_space<vmem>>, vector<32x32xf32>
    %cst = arith.constant dense<0.000000e+00> : vector<128x32xf32>
    %2 = tpu.matmul %0, %1, %cst {dimension_numbers = #tpu.dot_dimension_numbers<[1], [0], [0], [1], [0, 0, 1, 1], [], []>} : vector<128x32xf32>, vector<32x32xf32>, vector<128x32xf32> -> vector<128x32xf32>
    %c0_3 = arith.constant 0 : index
    %c0_4 = arith.constant 0 : index
    %3 = vector.load %arg3[%c0_3, %c0_4] : memref<1x32xf32, #tpu.memory_space<vmem>>, vector<1x32xf32>
    %4 = vector.broadcast %3 : vector<1x32xf32> to vector<128x32xf32>
    %5 = arith.addf %2, %4 : vector<128x32xf32>
    %c0_5 = arith.constant 0 : index
    %c0_6 = arith.constant 0 : index
    %6 = vector.load %arg4[%c0_5, %c0_6] : memref<128x32xf32, #tpu.memory_space<vmem>>, vector<128x32xf32>
    tpu.vector_store %arg4[%c0_5, %c0_6], %5 {strides = array<i32>} : memref<128x32xf32, #tpu.memory_space<vmem>>, vector<128x32xf32>,
    return
  }
  func.func @transform_0(%arg0: i32) -> (i32, i32) {
    %c0_i32 = arith.constant 0 : i32
    %c0_i32_0 = arith.constant 0 : i32
    return %arg0, %c0_i32 : i32, i32
  }
  func.func @transform_1(%arg0: i32) -> (i32, i32) {
    %c0_i32 = arith.constant 0 : i32
    %c0_i32_0 = arith.constant 0 : i32
    %c0_i32_1 = arith.constant 0 : i32
    return %c0_i32, %c0_i32_0 : i32, i32
  }
  func.func @transform_2(%arg0: i32) -> (i32, i32) {
    %c0_i32 = arith.constant 0 : i32
    %c0_i32_0 = arith.constant 0 : i32
    %c0_i32_1 = arith.constant 0 : i32
    return %c0_i32, %c0_i32_0 : i32, i32
  }
  func.func @transform_3(%arg0: i32) -> (i32, i32) {
    %c0_i32 = arith.constant 0 : i32
    %c0_i32_0 = arith.constant 0 : i32
    return %arg0, %c0_i32 : i32, i32
  }
}

</mosaic_0001>

<bundles_post_ra>
// kernel: mlp_ode_forward.1
= control target key start
LH: loop header
LB: loop body
LE: loop exit
PB: predicated region body
PF: predicated region fallthrough
CT: control target
= control target key end

     0   :  { %s460_s12 = smov 0   ;;  %s567_s0 = inlined_call_operand.vmem [shape: f32[256,32], index: 0, kind: input, shape index: {}]   ;;  %s568_s1 = inlined_call_operand.vmem [shape: f32[32,32], index: 1, kind: input, shape index: {}]   ;;  %s569_s2 = inlined_call_operand.vmem [shape: f32[1,32], index: 2, kind: input, shape index: {}]   ;;  %s570_s3 = inlined_call_operand.vmem [shape: f32[256,32], index: 3, kind: output, shape index: {}]  }
   0x1 LB: > { %s384_s13 = sadd.s32 4294967295, %s438_s12   ;;  %p388_p0 = scmp.ge.s32.totalorder %s438_s12, 1  ;;  %s438_s12 = sphi %s460_s12, %s13_s12  }
   0x2   : > { %p138_p1 = scmp.lt.s32.totalorder %s438_s12, 3 }
   0x4   : > { %p139_p2 = pnand %p388_p0, %p138_p1 }
   0x5   : > { %s389_s18 = sshll.u32 (!%p139_p2), %s384_s13, 4 }
   0x6   : > { %142 = sbr.rel (%p139_p2) target bundleno = 179 (0xb3), region = 32  ;;  %p163_p3 = scmp.lt.s32.totalorder (!%p139_p2), %s389_s18, 31 }
   0xb   : > { %v193_v0 = vld [vmem:[%s568_s1 + $0x18] sm:$0xff]  ;;  %v192_v1 = vld [vmem:[%s568_s1 + $0x10] sm:$0xff]  ;;  %v191_v2 = vld [vmem:[%s568_s1 + $0x8] sm:$0xff]  ;;  %s572_s18 = smov (!%p163_p3, %s389_s18), 31  ;;  %vm198_vm0 = vcmask 261120  }
   0xc   : > { %412 = vmatpush.msra.mxu2 %v193_v0  ;;  %413 = vmatpush.msra.mxu3 %v193_v0  ;;  %v190_v3 = vld [vmem:[%s568_s1] sm:$0xff]  ;;  %s390_s23 = sshll.u32 %s572_s18, 3 }
   0xd   : > { %259 = vmatpush.msra.mxu0 %v193_v0  ;;  %411 = vmatpush.msra.mxu1 %v193_v0  ;;  %s488_s26 = scalar_lea.vmem %s567_s0, %s390_s23  ;;  %v431_v20 = vld [vmem:[%s569_s2] ss:$0 sm:$0xff]  ;;  %s530_s4 = scalar_lea.vmem %s570_s3, %s390_s23 }
   0xe   : > { %415 = vmatpush.msra.mxu2 %v192_v1  ;;  %416 = vmatpush.msra.mxu3 %v192_v1  ;;  %v182_v4 = vld [vmem:[%s488_s26 + $0x40] sm:$0xff]  ;;  %v183_v8 = vld [vmem:[%s488_s26 + $0x48] sm:$0xff]  ;;  %v184_v12 = vld [vmem:[%s488_s26 + $0x50] sm:$0xff] }
   0xf   : > { %260 = vmatpush.msra.mxu0 %v192_v1  ;;  %414 = vmatpush.msra.mxu1 %v192_v1  ;;  %v186_v5 = vld [vmem:[%s488_s26 + $0x60] sm:$0xff]  ;;  %v187_v9 = vld [vmem:[%s488_s26 + $0x68] sm:$0xff]  ;;  %v188_v13 = vld [vmem:[%s488_s26 + $0x70] sm:$0xff] }
  0x10   : > { %418 = vmatpush.msra.mxu2 %v191_v2  ;;  %419 = vmatpush.msra.mxu3 %v191_v2  ;;  %v174_v6 = vld [vmem:[%s488_s26] sm:$0xff]  ;;  %v175_v10 = vld [vmem:[%s488_s26 + $0x8] sm:$0xff]  ;;  %v176_v14 = vld [vmem:[%s488_s26 + $0x10] sm:$0xff] }
  0x11   : > { %261 = vmatpush.msra.mxu0 %v191_v2  ;;  %417 = vmatpush.msra.mxu1 %v191_v2  ;;  %v178_v7 = vld [vmem:[%s488_s26 + $0x20] sm:$0xff]  ;;  %v179_v11 = vld [vmem:[%s488_s26 + $0x28] sm:$0xff]  ;;  %v180_v15 = vld [vmem:[%s488_s26 + $0x30] sm:$0xff] }
  0x12   : > { %421 = vmatpush.msra.mxu2 %v190_v3  ;;  %422 = vmatpush.msra.mxu3 %v190_v3  ;;  %v185_v16 = vld [vmem:[%s488_s26 + $0x58] sm:$0xff] }
  0x13   : > { %401 = vmatmul.msk.f32.vlgmr.msra.gmra.mxu2 %vm198_vm0, %v182_v4  ;;  %405 = vmatmul.msk.f32.vlgmr.msra.gmra.mxu3 %vm198_vm0, %v186_v5  ;;  %v189_v17 = vld [vmem:[%s488_s26 + $0x78] sm:$0xff] }
  0x14   : > { %262 = vmatpush.msra.mxu0 %v190_v3  ;;  %420 = vmatpush.msra.mxu1 %v190_v3  ;;  %v177_v18 = vld [vmem:[%s488_s26 + $0x18] sm:$0xff] }
  0x15   : > { %393 = vmatmul.msk.f32.vlgmr.msra.gmra.mxu0 %vm198_vm0, %v174_v6  ;;  %397 = vmatmul.msk.f32.vlgmr.msra.gmra.mxu1 %vm198_vm0, %v178_v7  ;;  %v181_v19 = vld [vmem:[%s488_s26 + $0x38] sm:$0xff] }
  0x1b   : > { %402 = vmatmul.msk.f32.gmra.mxu2 %vm198_vm0, %v183_v8  ;;  %406 = vmatmul.msk.f32.gmra.mxu3 %vm198_vm0, %v187_v9 }
  0x1d   : > { %394 = vmatmul.msk.f32.gmra.mxu0 %vm198_vm0, %v175_v10  ;;  %398 = vmatmul.msk.f32.gmra.mxu1 %vm198_vm0, %v179_v11 }
  0x23   : > { %403 = vmatmul.msk.f32.gmra.mxu2 %vm198_vm0, %v184_v12  ;;  %407 = vmatmul.msk.f32.gmra.mxu3 %vm198_vm0, %v188_v13 }
  0x25   : > { %395 = vmatmul.msk.f32.gmra.mxu0 %vm198_vm0, %v176_v14  ;;  %399 = vmatmul.msk.f32.gmra.mxu1 %vm198_vm0, %v180_v15 }
  0x2b   : > { %404 = vmatmul.msk.f32.gmra.mxu2 %vm198_vm0, %v185_v16  ;;  %408 = vmatmul.msk.f32.gmra.mxu3 %vm198_vm0, %v189_v17 }
  0x2d   : > { %396 = vmatmul.msk.f32.gmra.mxu0 %vm198_vm0, %v177_v18  ;;  %400 = vmatmul.msk.f32.gmra.mxu1 %vm198_vm0, %v181_v19 }
  0x92   : > { %v264_v21 = vpop.f32.mrf.mxu0  ;;  %v276_v22 = vpop.f32.mrf.mxu1 }
  0x93   : > { %v265_v23 = vadd.f32 %v431_v20, %v264_v21  ;;  %v277_v24 = vadd.f32 %v431_v20, %v276_v22 }
  0x95   : > { %312 = vst.msk [vmem:[%s530_s4] sm:$0xff] %vm198_vm0, %v265_v23 }
  0x96   : > { %316 = vst.msk [vmem:[%s530_s4 + $0x20] sm:$0xff] %vm198_vm0, %v277_v24  ;;  %v288_v25 = vpop.f32.mrf.mxu2  ;;  %v300_v26 = vpop.f32.mrf.mxu3 }
  0x97   : > { %v289_v27 = vadd.f32 %v431_v20, %v288_v25  ;;  %v301_v28 = vadd.f32 %v431_v20, %v300_v26 }
  0x99   : > { %320 = vst.msk [vmem:[%s530_s4 + $0x40] sm:$0xff] %vm198_vm0, %v289_v27 }
  0x9a   : > { %324 = vst.msk [vmem:[%s530_s4 + $0x60] sm:$0xff] %vm198_vm0, %v301_v28  ;;  %v267_v29 = vpop.f32.mrf.mxu0  ;;  %v279_v30 = vpop.f32.mrf.mxu1 }
  0x9b   : > { %v268_v31 = vadd.f32 %v431_v20, %v267_v29  ;;  %v280_v32 = vadd.f32 %v431_v20, %v279_v30 }
  0x9d   : > { %313 = vst.msk [vmem:[%s530_s4 + $0x8] sm:$0xff] %vm198_vm0, %v268_v31 }
  0x9e   : > { %317 = vst.msk [vmem:[%s530_s4 + $0x28] sm:$0xff] %vm198_vm0, %v280_v32  ;;  %v291_v33 = vpop.f32.mrf.mxu2  ;;  %v303_v34 = vpop.f32.mrf.mxu3 }
  0x9f   : > { %v292_v35 = vadd.f32 %v431_v20, %v291_v33  ;;  %v304_v36 = vadd.f32 %v431_v20, %v303_v34 }
  0xa1   : > { %321 = vst.msk [vmem:[%s530_s4 + $0x48] sm:$0xff] %vm198_vm0, %v292_v35 }
  0xa2   : > { %325 = vst.msk [vmem:[%s530_s4 + $0x68] sm:$0xff] %vm198_vm0, %v304_v36  ;;  %v270_v37 = vpop.f32.mrf.mxu0  ;;  %v282_v38 = vpop.f32.mrf.mxu1 }
  0xa3   : > { %v271_v39 = vadd.f32 %v431_v20, %v270_v37  ;;  %v283_v40 = vadd.f32 %v431_v20, %v282_v38 }
  0xa5   : > { %314 = vst.msk [vmem:[%s530_s4 + $0x10] sm:$0xff] %vm198_vm0, %v271_v39 }
  0xa6   : > { %318 = vst.msk [vmem:[%s530_s4 + $0x30] sm:$0xff] %vm198_vm0, %v283_v40  ;;  %v294_v41 = vpop.f32.mrf.mxu2  ;;  %v306_v42 = vpop.f32.mrf.mxu3 }
  0xa7   : > { %v295_v43 = vadd.f32 %v431_v20, %v294_v41  ;;  %v307_v44 = vadd.f32 %v431_v20, %v306_v42 }
  0xa9   : > { %322 = vst.msk [vmem:[%s530_s4 + $0x50] sm:$0xff] %vm198_vm0, %v295_v43 }
  0xaa   : > { %326 = vst.msk [vmem:[%s530_s4 + $0x70] sm:$0xff] %vm198_vm0, %v307_v44  ;;  %v273_v45 = vpop.f32.mrf.mxu0  ;;  %v285_v46 = vpop.f32.mrf.mxu1 }
  0xab   : > { %v274_v47 = vadd.f32 %v431_v20, %v273_v45  ;;  %v286_v48 = vadd.f32 %v431_v20, %v285_v46 }
  0xad   : > { %315 = vst.msk [vmem:[%s530_s4 + $0x18] sm:$0xff] %vm198_vm0, %v274_v47 }
  0xae   : > { %319 = vst.msk [vmem:[%s530_s4 + $0x38] sm:$0xff] %vm198_vm0, %v286_v48  ;;  %v297_v49 = vpop.f32.mrf.mxu2  ;;  %v309_v50 = vpop.f32.mrf.mxu3 }
  0xaf   : > { %v298_v51 = vadd.f32 %v431_v20, %v297_v49  ;;  %v310_v52 = vadd.f32 %v431_v20, %v309_v50 }
  0xb1   : > { %323 = vst.msk [vmem:[%s530_s4 + $0x58] sm:$0xff] %vm198_vm0, %v298_v51 }
  0xb2   : > { %327 = vst.msk [vmem:[%s530_s4 + $0x78] sm:$0xff] %vm198_vm0, %v310_v52 }
  0xb3 PF: > { %s13_s12 = sadd.s32 1, %s438_s12  }
  0xb4   : > { %p10_p4 = scmp.ge.s32.totalorder %s13_s12, 4  }
  0xb6   :  { %12 = sbr.rel (!%p10_p4) target bundleno = 1 (0x1), region = 62 }

</bundles_post_ra>
